<compile_context>
chip_gen: v7x
topology: tpu7x:2x2x1
jax: 0.10.0
libtpu: 0.0.40
codegen_flags: <defaults>
</compile_context>

<pallas_src>
import functools

import jax
import jax.numpy as jnp
from jax.experimental import pallas as pl
from jax.experimental.pallas import tpu as pltpu

# Per-layer (d_in, d_out) of the PyTorch module.
_DIMS = ((8, 16), (16, 32), (32, 64), (64, 8))


def _round_up(x, m):
    return (x + m - 1) // m * m


def _choose_tile(batch, *, tm_max=8192, min_split=2048):
    """Pick the batch-lane tile size (always a multiple of 128).

    - Small batches: one tile exactly covering the (128-rounded) batch.
    - Large batches: tiles capped at tm_max, tile count forced even so the
      'parallel' grid axis splits evenly across v7x's two TensorCores.
    """
    need = _round_up(max(batch, 128), 128)
    if need <= min_split:
        return need
    n_tiles = max(2, -(-need // tm_max))
    if n_tiles % 2:
        n_tiles += 1
    return _round_up(-(-need // n_tiles), 128)


def _mlp_kernel(xT_ref, w1, b1, w2, b2, w3, b3, w4, b4, oT_ref, *, cm):
    """Feature-major MLP on one (8, tm) batch-lane tile.

    Activations are (features, lanes): every matmul result and every store is
    lane-dense (128 lanes), and the tile is processed in `cm`-lane chunks so
    the largest intermediate (64, cm) stays within the vreg file.
    """
    tm = xT_ref.shape[1]
    layers = ((w1, b1), (w2, b2), (w3, b3), (w4, b4))
    off = 0
    while off < tm:                       # static (trace-time) chunk loop
        c = min(cm, tm - off)
        h = xT_ref[:, off:off + c]        # (8, c) static slice, lane-dense
        for li, (w, b) in enumerate(layers):
            h = jnp.dot(w[...], h, preferred_element_type=jnp.float32) + b[...]
            if li < 3:                    # ReLU after net1, net2 and before net4's
                h = jnp.maximum(h, 0.0)   # Linear; none after the final Linear
        oT_ref[:, off:off + c] = h.astype(oT_ref.dtype)
        off += c


def _prep_params(params):
    """Weights kept in PyTorch (d_out, d_in) layout; biases as (d_out, 1) columns."""
    flat, specs = [], []
    for (d_in, d_out), (w, b) in zip(_DIMS, params):
        assert w.shape == (d_out, d_in) and b.shape == (d_out,)
        w = w.astype(jnp.float32)
        b = b.astype(jnp.float32).reshape(d_out, 1)
        flat += [w, b]
        # Whole-array blocks with constant index_maps -> loaded once, resident.
        specs += [pl.BlockSpec(w.shape, lambda i: (0, 0)),
                  pl.BlockSpec(b.shape, lambda i: (0, 0))]
    return flat, specs


def dummy_model_forward_feature_major(xT, params, *, cm=512, tm_max=8192):
    """Fast path: activations stay feature-major end-to-end.

    xT: (8, batch) float32  ->  (8, batch) float32.  No pads, no transposes.
    """
    d_in, batch = xT.shape
    assert d_in == 8
    tm = _choose_tile(batch, tm_max=tm_max)
    n_tiles = -(-batch // tm)

    flat_params, param_specs = _prep_params(params)

    grid_spec = pltpu.PrefetchScalarGridSpec(
        num_scalar_prefetch=0,
        grid=(n_tiles,),
        in_specs=[pl.BlockSpec((8, tm), lambda i: (0, i))] + param_specs,
        out_specs=pl.BlockSpec((8, tm), lambda i: (0, i)),
    )

    # Right-sized VMEM limit: double-buffered in/out tiles + weights + slack.
    vmem_limit = 4 * (8 * tm * 4) + (4 << 20)

    return pl.pallas_call(
        functools.partial(_mlp_kernel, cm=cm),
        out_shape=jax.ShapeDtypeStruct((8, batch), jnp.float32),
        grid_spec=grid_spec,
        compiler_params=pltpu.CompilerParams(
            dimension_semantics=("parallel",),   # batch tiles shard across TCs (v7x)
            vmem_limit_bytes=int(vmem_limit),
        ),
    )(xT.astype(jnp.float32), *flat_params)


def dummy_model_forward(x, params, *, cm=512, tm_max=8192):
    """Module-compatible API: x (batch, 8) -> (batch, 8).

    Only does the two layout flips this API forces; a surrounding model that
    keeps activations feature-major should call
    `dummy_model_forward_feature_major` directly and pay for neither.
    """
    batch, d_in = x.shape
    assert d_in == 8
    outT = dummy_model_forward_feature_major(x.T, params, cm=cm, tm_max=tm_max)
    return outT.T


def init_params(key):
    """Deterministic init mirroring nn.Linear shapes (PyTorch (d_out, d_in) layout)."""
    # TODO(synk): torch.manual_seed(0)-exact parameter values are not reproducible
    # without torch; shapes/init-style match, forward math is identical.
    params = []
    for d_in, d_out in _DIMS:
        key, kw, kb = jax.random.split(key, 3)
        bound = float(d_in) ** -0.5
        w = jax.random.uniform(kw, (d_out, d_in), jnp.float32, -bound, bound)
        b = jax.random.uniform(kb, (d_out,), jnp.float32, -bound, bound)
        params.append((w, b))
    return params


def reference_forward(x, params):
    h = x
    for i, (w, b) in enumerate(params):
        h = h @ w.T + b
        if i < 3:
            h = jnp.maximum(h, 0.0)
    return h


if __name__ == "__main__":
    key = jax.random.PRNGKey(0)
    kx, kp = jax.random.split(key)
    batch = 600   # not a multiple of 128: exercises the ragged (masked) edge tile
    x = jax.random.normal(kx, (batch, 8), jnp.float32)
    params = init_params(kp)

    ref = reference_forward(x, params)

    # Module-compatible (batch, 8) path.
    out = jax.block_until_ready(dummy_model_forward(x, params))
    assert out.shape == (batch, 8), out.shape
    assert jnp.allclose(out, ref, atol=2e-5, rtol=2e-5), (
        "mismatch vs reference, max abs diff = %e"
        % float(jnp.max(jnp.abs(out - ref))))

    # Zero-transpose feature-major path.
    outT = jax.block_until_ready(dummy_model_forward_feature_major(x.T, params))
    assert outT.shape == (8, batch), outT.shape
    assert jnp.allclose(outT.T, ref, atol=2e-5, rtol=2e-5), (
        "feature-major mismatch, max abs diff = %e"
        % float(jnp.max(jnp.abs(outT.T - ref))))

    print("KERNEL_OK")
</pallas_src>

<mosaic_0001>
module attributes {stable_mosaic.version = 11 : i64} {
  func.func @_mlp_kernel(%arg0: i32, %arg1: memref<8x640xf32, #tpu.memory_space<vmem>>, %arg2: memref<16x8xf32, #tpu.memory_space<vmem>>, %arg3: memref<16x1xf32, #tpu.memory_space<vmem>>, %arg4: memref<32x16xf32, #tpu.memory_space<vmem>>, %arg5: memref<32x1xf32, #tpu.memory_space<vmem>>, %arg6: memref<64x32xf32, #tpu.memory_space<vmem>>, %arg7: memref<64x1xf32, #tpu.memory_space<vmem>>, %arg8: memref<8x64xf32, #tpu.memory_space<vmem>>, %arg9: memref<8x1xf32, #tpu.memory_space<vmem>>, %arg10: memref<8x640xf32, #tpu.memory_space<vmem>>) attributes {dimension_semantics = [#tpu.dimension_semantics<parallel>], iteration_bounds = array<i64: 1>, scalar_prefetch = 0 : i64, scratch_operands = 0 : i64, tpu.core_type = #tpu.core_type<tc>, window_params = [{transform_indices = @transform_0, window_bounds = array<i64: 8, 640>}, {pipeline_mode = #tpu.pipeline_mode<synchronous>, transform_indices = @transform_1, window_bounds = array<i64: 16, 8>}, {pipeline_mode = #tpu.pipeline_mode<synchronous>, transform_indices = @transform_2, window_bounds = array<i64: 16, 1>}, {pipeline_mode = #tpu.pipeline_mode<synchronous>, transform_indices = @transform_3, window_bounds = array<i64: 32, 16>}, {pipeline_mode = #tpu.pipeline_mode<synchronous>, transform_indices = @transform_4, window_bounds = array<i64: 32, 1>}, {pipeline_mode = #tpu.pipeline_mode<synchronous>, transform_indices = @transform_5, window_bounds = array<i64: 64, 32>}, {pipeline_mode = #tpu.pipeline_mode<synchronous>, transform_indices = @transform_6, window_bounds = array<i64: 64, 1>}, {pipeline_mode = #tpu.pipeline_mode<synchronous>, transform_indices = @transform_7, window_bounds = array<i64: 8, 64>}, {pipeline_mode = #tpu.pipeline_mode<synchronous>, transform_indices = @transform_8, window_bounds = array<i64: 8, 1>}, {transform_indices = @transform_9, window_bounds = array<i64: 8, 640>}]} {
    %c0 = arith.constant 0 : index
    %c0_0 = arith.constant 0 : index
    %0 = vector.load %arg1[%c0, %c0_0] : memref<8x640xf32, #tpu.memory_space<vmem>>, vector<8x512xf32>
    %c0_1 = arith.constant 0 : index
    %c0_2 = arith.constant 0 : index
    %1 = vector.load %arg2[%c0_1, %c0_2] : memref<16x8xf32, #tpu.memory_space<vmem>>, vector<16x8xf32>
    %cst = arith.constant dense<0.000000e+00> : vector<16x512xf32>
    %2 = tpu.matmul %1, %0, %cst {dimension_numbers = #tpu.dot_dimension_numbers<[1], [0], [0], [1], [0, 0, 1, 1], [], []>} : vector<16x8xf32>, vector<8x512xf32>, vector<16x512xf32> -> vector<16x512xf32>
    %c0_3 = arith.constant 0 : index
    %c0_4 = arith.constant 0 : index
    %3 = vector.load %arg3[%c0_3, %c0_4] : memref<16x1xf32, #tpu.memory_space<vmem>>, vector<16x1xf32>
    %4 = vector.broadcast %3 : vector<16x1xf32> to vector<16x512xf32>
    %5 = arith.addf %2, %4 : vector<16x512xf32>
    %cst_5 = arith.constant 0.000000e+00 : f32
    %6 = vector.broadcast %cst_5 : f32 to vector<16x512xf32>
    %7 = arith.maximumf %5, %6 : vector<16x512xf32>
    %c0_6 = arith.constant 0 : index
    %c0_7 = arith.constant 0 : index
    %8 = vector.load %arg4[%c0_6, %c0_7] : memref<32x16xf32, #tpu.memory_space<vmem>>, vector<32x16xf32>
    %cst_8 = arith.constant dense<0.000000e+00> : vector<32x512xf32>
    %9 = tpu.matmul %8, %7, %cst_8 {dimension_numbers = #tpu.dot_dimension_numbers<[1], [0], [0], [1], [0, 0, 1, 1], [], []>} : vector<32x16xf32>, vector<16x512xf32>, vector<32x512xf32> -> vector<32x512xf32>
    %c0_9 = arith.constant 0 : index
    %c0_10 = arith.constant 0 : index
    %10 = vector.load %arg5[%c0_9, %c0_10] : memref<32x1xf32, #tpu.memory_space<vmem>>, vector<32x1xf32>
    %11 = vector.broadcast %10 : vector<32x1xf32> to vector<32x512xf32>
    %12 = arith.addf %9, %11 : vector<32x512xf32>
    %cst_11 = arith.constant 0.000000e+00 : f32
    %13 = vector.broadcast %cst_11 : f32 to vector<32x512xf32>
    %14 = arith.maximumf %12, %13 : vector<32x512xf32>
    %c0_12 = arith.constant 0 : index
    %c0_13 = arith.constant 0 : index
    %15 = vector.load %arg6[%c0_12, %c0_13] : memref<64x32xf32, #tpu.memory_space<vmem>>, vector<64x32xf32>
    %cst_14 = arith.constant dense<0.000000e+00> : vector<64x512xf32>
    %16 = tpu.matmul %15, %14, %cst_14 {dimension_numbers = #tpu.dot_dimension_numbers<[1], [0], [0], [1], [0, 0, 1, 1], [], []>} : vector<64x32xf32>, vector<32x512xf32>, vector<64x512xf32> -> vector<64x512xf32>
    %c0_15 = arith.constant 0 : index
    %c0_16 = arith.constant 0 : index
    %17 = vector.load %arg7[%c0_15, %c0_16] : memref<64x1xf32, #tpu.memory_space<vmem>>, vector<64x1xf32>
    %18 = vector.broadcast %17 : vector<64x1xf32> to vector<64x512xf32>
    %19 = arith.addf %16, %18 : vector<64x512xf32>
    %cst_17 = arith.constant 0.000000e+00 : f32
    %20 = vector.broadcast %cst_17 : f32 to vector<64x512xf32>
    %21 = arith.maximumf %19, %20 : vector<64x512xf32>
    %c0_18 = arith.constant 0 : index
    %c0_19 = arith.constant 0 : index
    %22 = vector.load %arg8[%c0_18, %c0_19] : memref<8x64xf32, #tpu.memory_space<vmem>>, vector<8x64xf32>
    %cst_20 = arith.constant dense<0.000000e+00> : vector<8x512xf32>
    %23 = tpu.matmul %22, %21, %cst_20 {dimension_numbers = #tpu.dot_dimension_numbers<[1], [0], [0], [1], [0, 0, 1, 1], [], []>} : vector<8x64xf32>, vector<64x512xf32>, vector<8x512xf32> -> vector<8x512xf32>
    %c0_21 = arith.constant 0 : index
    %c0_22 = arith.constant 0 : index
    %24 = vector.load %arg9[%c0_21, %c0_22] : memref<8x1xf32, #tpu.memory_space<vmem>>, vector<8x1xf32>
    %25 = vector.broadcast %24 : vector<8x1xf32> to vector<8x512xf32>
    %26 = arith.addf %23, %25 : vector<8x512xf32>
    %c0_23 = arith.constant 0 : index
    %c0_24 = arith.constant 0 : index
    %27 = vector.load %arg10[%c0_23, %c0_24] : memref<8x640xf32, #tpu.memory_space<vmem>>, vector<8x512xf32>
    tpu.vector_store %arg10[%c0_23, %c0_24], %26 {strides = array<i32>} : memref<8x640xf32, #tpu.memory_space<vmem>>, vector<8x512xf32>,
    %c0_25 = arith.constant 0 : index
    %c512 = arith.constant 512 : index
    %28 = vector.load %arg1[%c0_25, %c512] : memref<8x640xf32, #tpu.memory_space<vmem>>, vector<8x128xf32>
    %c0_26 = arith.constant 0 : index
    %c0_27 = arith.constant 0 : index
    %29 = vector.load %arg2[%c0_26, %c0_27] : memref<16x8xf32, #tpu.memory_space<vmem>>, vector<16x8xf32>
    %cst_28 = arith.constant dense<0.000000e+00> : vector<16x128xf32>
    %30 = tpu.matmul %29, %28, %cst_28 {dimension_numbers = #tpu.dot_dimension_numbers<[1], [0], [0], [1], [0, 0, 1, 1], [], []>} : vector<16x8xf32>, vector<8x128xf32>, vector<16x128xf32> -> vector<16x128xf32>
    %c0_29 = arith.constant 0 : index
    %c0_30 = arith.constant 0 : index
    %31 = vector.load %arg3[%c0_29, %c0_30] : memref<16x1xf32, #tpu.memory_space<vmem>>, vector<16x1xf32>
    %32 = vector.broadcast %31 : vector<16x1xf32> to vector<16x128xf32>
    %33 = arith.addf %30, %32 : vector<16x128xf32>
    %cst_31 = arith.constant 0.000000e+00 : f32
    %34 = vector.broadcast %cst_31 : f32 to vector<16x128xf32>
    %35 = arith.maximumf %33, %34 : vector<16x128xf32>
    %c0_32 = arith.constant 0 : index
    %c0_33 = arith.constant 0 : index
    %36 = vector.load %arg4[%c0_32, %c0_33] : memref<32x16xf32, #tpu.memory_space<vmem>>, vector<32x16xf32>
    %cst_34 = arith.constant dense<0.000000e+00> : vector<32x128xf32>
    %37 = tpu.matmul %36, %35, %cst_34 {dimension_numbers = #tpu.dot_dimension_numbers<[1], [0], [0], [1], [0, 0, 1, 1], [], []>} : vector<32x16xf32>, vector<16x128xf32>, vector<32x128xf32> -> vector<32x128xf32>
    %c0_35 = arith.constant 0 : index
    %c0_36 = arith.constant 0 : index
    %38 = vector.load %arg5[%c0_35, %c0_36] : memref<32x1xf32, #tpu.memory_space<vmem>>, vector<32x1xf32>
    %39 = vector.broadcast %38 : vector<32x1xf32> to vector<32x128xf32>
    %40 = arith.addf %37, %39 : vector<32x128xf32>
    %cst_37 = arith.constant 0.000000e+00 : f32
    %41 = vector.broadcast %cst_37 : f32 to vector<32x128xf32>
    %42 = arith.maximumf %40, %41 : vector<32x128xf32>
    %c0_38 = arith.constant 0 : index
    %c0_39 = arith.constant 0 : index
    %43 = vector.load %arg6[%c0_38, %c0_39] : memref<64x32xf32, #tpu.memory_space<vmem>>, vector<64x32xf32>
    %cst_40 = arith.constant dense<0.000000e+00> : vector<64x128xf32>
    %44 = tpu.matmul %43, %42, %cst_40 {dimension_numbers = #tpu.dot_dimension_numbers<[1], [0], [0], [1], [0, 0, 1, 1], [], []>} : vector<64x32xf32>, vector<32x128xf32>, vector<64x128xf32> -> vector<64x128xf32>
    %c0_41 = arith.constant 0 : index
    %c0_42 = arith.constant 0 : index
    %45 = vector.load %arg7[%c0_41, %c0_42] : memref<64x1xf32, #tpu.memory_space<vmem>>, vector<64x1xf32>
    %46 = vector.broadcast %45 : vector<64x1xf32> to vector<64x128xf32>
    %47 = arith.addf %44, %46 : vector<64x128xf32>
    %cst_43 = arith.constant 0.000000e+00 : f32
    %48 = vector.broadcast %cst_43 : f32 to vector<64x128xf32>
    %49 = arith.maximumf %47, %48 : vector<64x128xf32>
    %c0_44 = arith.constant 0 : index
    %c0_45 = arith.constant 0 : index
    %50 = vector.load %arg8[%c0_44, %c0_45] : memref<8x64xf32, #tpu.memory_space<vmem>>, vector<8x64xf32>
    %cst_46 = arith.constant dense<0.000000e+00> : vector<8x128xf32>
    %51 = tpu.matmul %50, %49, %cst_46 {dimension_numbers = #tpu.dot_dimension_numbers<[1], [0], [0], [1], [0, 0, 1, 1], [], []>} : vector<8x64xf32>, vector<64x128xf32>, vector<8x128xf32> -> vector<8x128xf32>
    %c0_47 = arith.constant 0 : index
    %c0_48 = arith.constant 0 : index
    %52 = vector.load %arg9[%c0_47, %c0_48] : memref<8x1xf32, #tpu.memory_space<vmem>>, vector<8x1xf32>
    %53 = vector.broadcast %52 : vector<8x1xf32> to vector<8x128xf32>
    %54 = arith.addf %51, %53 : vector<8x128xf32>
    %c0_49 = arith.constant 0 : index
    %c512_50 = arith.constant 512 : index
    %55 = vector.load %arg10[%c0_49, %c512_50] : memref<8x640xf32, #tpu.memory_space<vmem>>, vector<8x128xf32>
    tpu.vector_store %arg10[%c0_49, %c512_50], %54 {strides = array<i32>} : memref<8x640xf32, #tpu.memory_space<vmem>>, vector<8x128xf32>,
    return
  }
  func.func @transform_0(%arg0: i32) -> (i32, i32) {
    %c0_i32 = arith.constant 0 : i32
    %c0_i32_0 = arith.constant 0 : i32
    return %c0_i32, %arg0 : i32, i32
  }
  func.func @transform_1(%arg0: i32) -> (i32, i32) {
    %c0_i32 = arith.constant 0 : i32
    %c0_i32_0 = arith.constant 0 : i32
    %c0_i32_1 = arith.constant 0 : i32
    return %c0_i32, %c0_i32_0 : i32, i32
  }
  func.func @transform_2(%arg0: i32) -> (i32, i32) {
    %c0_i32 = arith.constant 0 : i32
    %c0_i32_0 = arith.constant 0 : i32
    %c0_i32_1 = arith.constant 0 : i32
    return %c0_i32, %c0_i32_0 : i32, i32
  }
  func.func @transform_3(%arg0: i32) -> (i32, i32) {
    %c0_i32 = arith.constant 0 : i32
    %c0_i32_0 = arith.constant 0 : i32
    %c0_i32_1 = arith.constant 0 : i32
    return %c0_i32, %c0_i32_0 : i32, i32
  }
  func.func @transform_4(%arg0: i32) -> (i32, i32) {
    %c0_i32 = arith.constant 0 : i32
    %c0_i32_0 = arith.constant 0 : i32
    %c0_i32_1 = arith.constant 0 : i32
    return %c0_i32, %c0_i32_0 : i32, i32
  }
  func.func @transform_5(%arg0: i32) -> (i32, i32) {
    %c0_i32 = arith.constant 0 : i32
    %c0_i32_0 = arith.constant 0 : i32
    %c0_i32_1 = arith.constant 0 : i32
    return %c0_i32, %c0_i32_0 : i32, i32
  }
  func.func @transform_6(%arg0: i32) -> (i32, i32) {
    %c0_i32 = arith.constant 0 : i32
    %c0_i32_0 = arith.constant 0 : i32
    %c0_i32_1 = arith.constant 0 : i32
    return %c0_i32, %c0_i32_0 : i32, i32
  }
  func.func @transform_7(%arg0: i32) -> (i32, i32) {
    %c0_i32 = arith.constant 0 : i32
    %c0_i32_0 = arith.constant 0 : i32
    %c0_i32_1 = arith.constant 0 : i32
    return %c0_i32, %c0_i32_0 : i32, i32
  }
  func.func @transform_8(%arg0: i32) -> (i32, i32) {
    %c0_i32 = arith.constant 0 : i32
    %c0_i32_0 = arith.constant 0 : i32
    %c0_i32_1 = arith.constant 0 : i32
    return %c0_i32, %c0_i32_0 : i32, i32
  }
  func.func @transform_9(%arg0: i32) -> (i32, i32) {
    %c0_i32 = arith.constant 0 : i32
    %c0_i32_0 = arith.constant 0 : i32
    return %c0_i32, %arg0 : i32, i32
  }
}

</mosaic_0001>

<bundles_post_ra>
// kernel: tpu_custom_call.1
= control target key start
LH: loop header
LB: loop body
LE: loop exit
PB: predicated region body
PF: predicated region fallthrough
CT: control target
= control target key end

     0   :  { %vm51_vm0 = vcmask 64512   ;;  %v1706_v5 = vmov 0.0   ;;  %s2041_s0 = inlined_call_operand.vmem [shape: f32[8,600], index: 0, kind: input, shape index: {}]   ;;  %s2042_s1 = inlined_call_operand.vmem [shape: f32[16,8], index: 1, kind: input, shape index: {}]   ;;  %s2043_s2 = inlined_call_operand.vmem [shape: f32[16,1], index: 2, kind: input, shape index: {}]   ;;  %s2044_s3 = inlined_call_operand.vmem [shape: f32[32,16], index: 3, kind: input, shape index: {}]   ;;  %s2045_s4 = inlined_call_operand.vmem [shape: f32[32,1], index: 4, kind: input, shape index: {}]   ;;  %s2046_s5 = inlined_call_operand.vmem [shape: f32[64,32], index: 5, kind: input, shape index: {}]   ;;  %s2047_s6 = inlined_call_operand.vmem [shape: f32[64,1], index: 6, kind: input, shape index: {}]   ;;  %s2048_s7 = inlined_call_operand.vmem [shape: f32[8,64], index: 7, kind: input, shape index: {}]   ;;  %s2049_s8 = inlined_call_operand.vmem [shape: f32[8,1], index: 8, kind: input, shape index: {}]   ;;  %s2050_s9 = inlined_call_operand.hbm [shape: f32[8,600], index: 9, kind: output, shape index: {}]  }
   0x1   :  { %v34_v0 = vld [vmem:[%s2041_s0 + $0x8] sm:$0xff]  ;;  %v36_v1 = vld [vmem:[%s2041_s0 + $0x18] sm:$0xff]  ;;  %v33_v2 = vld [vmem:[%s2041_s0] sm:$0xff]  ;;  %122 = vmatprep.mubr.f32.mxu0 %v1706_v5  ;;  %199 = vmatprep.mubr.f32.mxu1 %v1706_v5 }
   0x2   :  { %58 = vmatprep.subr.mxu0 %v34_v0  ;;  %135 = vmatprep.subr.mxu1 %v36_v1  ;;  %v35_v3 = vld [vmem:[%s2041_s0 + $0x10] sm:$0xff]  ;;  %v1776_v4 = vld [vmem:[%s2042_s1] sm:$0xff]  ;;  %v1792_v7 = vld [vmem:[%s2042_s1 + $0x8] sm:$0xff] }
   0x3   :  { %59 = vmatpush1.msra.mxu0 %v33_v2  ;;  %136 = vmatpush1.msra.mxu1 %v35_v3  ;;  %v39_v6 = vld [vmem:[%s2043_s2] sm:$0xff] }
   0x4   :  { %1466 = vmatmul.mubr.msk.f32.vlgmr.msra.gmra.mrb[0].mxu0 %vm51_vm0, %v1776_v4  ;;  %1468 = vmatmul.mubr.msk.f32.vlgmr.msra.gmra.mrb[0].mxu1 %vm51_vm0, %v1776_v4 }
   0x5   :  { %128 = vmatprep.mubr.f32.mxu0 %v1706_v5  ;;  %205 = vmatprep.mubr.f32.mxu1 %v1706_v5 }
   0x6   :  { %14 = vsyncpa [#allocation3], 0  ;;  %v1707_v8 = vmov 0   ;;  %v1053_v9 = vld [vmem:[%s2045_s4] sm:$0xff]  ;;  %v40_v10 = vld [vmem:[%s2043_s2 + $0x8] sm:$0xff]  ;;  %vm248_vm1 = vcmask 130048  }
   0x7   :  { %1680 = vset.pattern.permute.xlu0 %v1707_v8  ;;  %1681 = vset.pattern.permute.xlu1 %v1707_v8  ;;  %v226_v11 = vld [vmem:[%s2045_s4 + $0x10] sm:$0xff]  ;;  %v463_v12 = vld [vmem:[%s2047_s6] sm:$0xff]  ;;  %v225_v17 = vld [vmem:[%s2045_s4 + $0x8] sm:$0xff]  ;;  %vm511_vm2 = vcmask 261120   ;;  %vm801_vm3 = vcmask 523264   ;;  %vm1709_vm4 = vmmov 0  }
   0x8   :  { %43 = vperm.xlu0 %1680, %v39_v6   ;;  %230 = vperm.xlu1 %1681, %v1053_v9   ;;  %v465_v13 = vld [vmem:[%s2047_s6 + $0x10] sm:$0xff]  ;;  %v467_v14 = vld [vmem:[%s2047_s6 + $0x20] sm:$0xff]  ;;  %v227_v18 = vld [vmem:[%s2045_s4 + $0x18] sm:$0xff] }
   0x9   :  { %1467 = vmatmul.mubr.msk.f32.gmra.mrb[2].mxu0 %vm51_vm0, %v1792_v7  ;;  %1469 = vmatmul.mubr.msk.f32.gmra.mrb[2].mxu1 %vm51_vm0, %v1792_v7  ;;  %v469_v15 = vld [vmem:[%s2047_s6 + $0x30] sm:$0xff]  ;;  %v795_v16 = vld [vmem:[%s2049_s8] sm:$0xff]  ;;  %v464_v19 = vld [vmem:[%s2047_s6 + $0x8] sm:$0xff] }
   0xa   :  { %325 = vmatprep.mubr.f32.mxu0 %v1706_v5  ;;  %414 = vmatprep.mubr.f32.mxu1 %v1706_v5  ;;  %v466_v20 = vld [vmem:[%s2047_s6 + $0x18] sm:$0xff]  ;;  %v468_v21 = vld [vmem:[%s2047_s6 + $0x28] sm:$0xff]  ;;  %v1845_v53 = vld [vmem:[%s2044_s3] sm:$0xff] }
   0xb   :  { %v470_v22 = vld [vmem:[%s2047_s6 + $0x38] sm:$0xff]  ;;  %v1856_v54 = vld [vmem:[%s2044_s3 + $0x8] sm:$0xff]  ;;  %v1867_v55 = vld [vmem:[%s2044_s3 + $0x10] sm:$0xff] }
   0xc   :  { %48 = vperm.xlu0 %1680, %v40_v10   ;;  %235 = vperm.xlu1 %1681, %v225_v17   ;;  %v1878_v56 = vld [vmem:[%s2044_s3 + $0x18] sm:$0xff] }
  0x10   :  { %240 = vperm.xlu0 %1680, %v226_v11   ;;  %245 = vperm.xlu1 %1681, %v227_v18  }
  0x14   :  { %473 = vperm.xlu0 %1680, %v463_v12   ;;  %478 = vperm.xlu1 %1681, %v464_v19  }
  0x18   :  { %483 = vperm.xlu0 %1680, %v465_v13   ;;  %488 = vperm.xlu1 %1681, %v466_v20  }
  0x1c   :  { %493 = vperm.xlu0 %1680, %v467_v14   ;;  %498 = vperm.xlu1 %1681, %v468_v21  }
  0x20   :  { %503 = vperm.xlu0 %1680, %v469_v15   ;;  %508 = vperm.xlu1 %1681, %v470_v22  }
  0x24   :  { %958 = vperm.xlu0 %1680, %v39_v6   ;;  %963 = vperm.xlu1 %1681, %v40_v10  }
  0x28   :  { %1059 = vperm.xlu0 %1680, %v1053_v9   ;;  %1064 = vperm.xlu1 %1681, %v225_v17  }
  0x2c   :  { %1069 = vperm.xlu0 %1680, %v226_v11   ;;  %1074 = vperm.xlu1 %1681, %v227_v18  }
  0x30   :  { %1196 = vperm.xlu0 %1680, %v463_v12   ;;  %1201 = vperm.xlu1 %1681, %v464_v19  }
  0x34   :  { %1206 = vperm.xlu0 %1680, %v465_v13   ;;  %1211 = vperm.xlu1 %1681, %v466_v20  }
  0x38   :  { %1216 = vperm.xlu0 %1680, %v467_v14   ;;  %1221 = vperm.xlu1 %1681, %v468_v21  }
  0x3c   :  { %1226 = vperm.xlu0 %1680, %v469_v15   ;;  %1231 = vperm.xlu1 %1681, %v470_v22  }
  0x40   :  { %798 = vperm.xlu0 %1680, %v795_v16   ;;  %1375 = vperm.xlu1 %1681, %v795_v16  }
  0x87   :  { %v44_v23 = vpop.permute.xlu0 %43  ;;  %v231_v57 = vpop.permute.xlu1 %230 }
  0x8b   :  { %v49_v28 = vpop.permute.xlu0 %48  ;;  %v236_v0 = vpop.permute.xlu1 %235 }
  0xd7   :  { %v124_v24 = vpop.f32.mrb[0].mxu0  ;;  %v201_v25 = vpop.f32.mrb[0].mxu1 }
  0xd8   :  { %v126_v26 = vpop.f32.mrb[1].mxu0  ;;  %v203_v27 = vpop.f32.mrb[1].mxu1  ;;  %v125_v29 = vadd.f32 %v124_v24, %v44_v23  ;;  %v202_v30 = vadd.f32 %v201_v25, %v44_v23 }
  0xd9   :  { %v127_v31 = vadd.f32 %v126_v26, %v44_v23  ;;  %v204_v32 = vadd.f32 %v203_v27, %v44_v23 }
  0xda   :  { %v212_v41 = vmax.f32 %v125_v29, 0.0  ;;  %v214_v42 = vmax.f32 %v202_v30, 0.0 }
  0xdb   :  { %v213_v45 = vmax.f32 %v127_v31, 0.0  ;;  %v215_v46 = vmax.f32 %v204_v32, 0.0  ;;  %v246_v31 = vpop.permute.xlu1 %245 }
  0xdc   :  { %v130_v33 = vpop.f32.mrb[2].mxu0  ;;  %v207_v34 = vpop.f32.mrb[2].mxu1 }
  0xdd   :  { %v131_v35 = vadd.f32 %v130_v33, %v49_v28  ;;  %v208_v36 = vadd.f32 %v207_v34, %v49_v28  ;;  %v132_v37 = vpop.f32.mrb[3].mxu0  ;;  %v209_v38 = vpop.f32.mrb[3].mxu1 }
  0xde   :  { %v133_v39 = vadd.f32 %v132_v37, %v49_v28  ;;  %v210_v40 = vadd.f32 %v209_v38, %v49_v28  ;;  %v241_v28 = vpop.permute.xlu0 %240 }
  0xdf   :  { %v216_v43 = vmax.f32 %v131_v35, 0.0  ;;  %v218_v44 = vmax.f32 %v208_v36, 0.0 }
  0xe0   :  { %v217_v47 = vmax.f32 %v133_v39, 0.0  ;;  %v219_v48 = vmax.f32 %v210_v40, 0.0 }
  0xe1   :  { %v1597_v49 = vpack.c.bf16 %v216_v43, %v212_v41  ;;  %v1601_v50 = vpack.c.bf16 %v218_v44, %v214_v42 }
  0xe2   :  { %v1595_v51 = vpack.c.bf16 %v217_v47, %v213_v45  ;;  %v1599_v52 = vpack.c.bf16 %v219_v48, %v215_v46 }
  0xe4   :  { %1596 = vmatprep.subr.bf16.mxu0 %v1595_v51  ;;  %1600 = vmatprep.subr.bf16.mxu1 %v1599_v52 }
  0xe5   :  { %1598 = vmatpush1.bf16.msra.mxu0 %v1597_v49  ;;  %1602 = vmatpush1.bf16.msra.mxu1 %v1601_v50 }
  0xe8   :  { %1470 = vmatmul.mubr.msk.f32.vlgmr.msra.gmra.mrb[4].mxu0 %vm248_vm1, %v1845_v53  ;;  %1474 = vmatmul.mubr.msk.f32.vlgmr.msra.gmra.mrb[4].mxu1 %vm248_vm1, %v1845_v53 }
  0xe9   :  { %331 = vmatprep.mubr.f32.mxu0 %v1706_v5  ;;  %420 = vmatprep.mubr.f32.mxu1 %v1706_v5 }
  0xec   :  { %1471 = vmatmul.mubr.msk.f32.gmra.mrb[6].mxu0 %vm248_vm1, %v1856_v54  ;;  %1475 = vmatmul.mubr.msk.f32.gmra.mrb[6].mxu1 %vm248_vm1, %v1856_v54 }
  0xed   :  { %337 = vmatprep.mubr.f32.mxu0 %v1706_v5  ;;  %426 = vmatprep.mubr.f32.mxu1 %v1706_v5 }
  0xf0   :  { %1472 = vmatmul.mubr.msk.f32.gmra.mrb[8].mxu0 %vm248_vm1, %v1867_v55  ;;  %1476 = vmatmul.mubr.msk.f32.gmra.mrb[8].mxu1 %vm248_vm1, %v1867_v55 }
  0xf1   :  { %343 = vmatprep.mubr.f32.mxu0 %v1706_v5  ;;  %432 = vmatprep.mubr.f32.mxu1 %v1706_v5 }
  0xf4   :  { %1473 = vmatmul.mubr.msk.f32.gmra.mrb[10].mxu0 %vm248_vm1, %v1878_v56  ;;  %1477 = vmatmul.mubr.msk.f32.gmra.mrb[10].mxu1 %vm248_vm1, %v1878_v56 }
  0xf5   :  { %600 = vmatprep.mubr.f32.mxu0 %v1706_v5  ;;  %713 = vmatprep.mubr.f32.mxu1 %v1706_v5 }
 0x1bb   :  { %v327_v58 = vpop.f32.mrb[4].mxu0  ;;  %v416_v59 = vpop.f32.mrb[4].mxu1 }
 0x1bc   :  { %v417_v60 = vadd.f32 %v416_v59, %v231_v57  ;;  %v329_v61 = vpop.f32.mrb[5].mxu0  ;;  %v418_v62 = vpop.f32.mrb[5].mxu1  ;;  %v328_v1 = vadd.f32 %v327_v58, %v231_v57 }
 0x1bd   :  { %v419_v63 = vadd.f32 %v418_v62, %v231_v57  ;;  %v330_v2 = vadd.f32 %v329_v61, %v231_v57  ;;  %v1900_v61 = vld [vmem:[%s2046_s5 + $0x8] sm:$0xff]  ;;  %v1911_v62 = vld [vmem:[%s2046_s5 + $0x10] sm:$0xff] }
 0x1be   :  { %v441_v8 = vmax.f32 %v417_v60, 0.0  ;;  %v439_v16 = vmax.f32 %v328_v1, 0.0  ;;  %v1889_v60 = vld [vmem:[%s2046_s5] sm:$0xff]  ;;  %v1944_v1 = vld [vmem:[%s2046_s5 + $0x28] sm:$0xff] }
 0x1bf   :  { %v333_v3 = vpop.f32.mrb[6].mxu0  ;;  %v422_v6 = vpop.f32.mrb[6].mxu1  ;;  %v442_v13 = vmax.f32 %v419_v63, 0.0  ;;  %v440_v19 = vmax.f32 %v330_v2, 0.0  ;;  %v1922_v63 = vld [vmem:[%s2046_s5 + $0x18] sm:$0xff]  ;;  %v1955_v2 = vld [vmem:[%s2046_s5 + $0x30] sm:$0xff] }
 0x1c0   :  { %v334_v9 = vadd.f32 %v333_v3, %v236_v0  ;;  %v423_v10 = vadd.f32 %v422_v6, %v236_v0  ;;  %v335_v11 = vpop.f32.mrb[7].mxu0  ;;  %v424_v12 = vpop.f32.mrb[7].mxu1  ;;  %v1966_v3 = vld [vmem:[%s2046_s5 + $0x38] sm:$0xff] }
 0x1c1   :  { %v336_v14 = vadd.f32 %v335_v11, %v236_v0  ;;  %v425_v15 = vadd.f32 %v424_v12, %v236_v0  ;;  %v1933_v0 = vld [vmem:[%s2046_s5 + $0x20] sm:$0xff]  ;;  %v474_v11 = vpop.permute.xlu0 %473  ;;  %v479_v12 = vpop.permute.xlu1 %478 }
 0x1c2   :  { %v443_v17 = vmax.f32 %v334_v9, 0.0  ;;  %v445_v18 = vmax.f32 %v423_v10, 0.0 }
 0x1c3   :  { %v444_v20 = vmax.f32 %v336_v14, 0.0  ;;  %v446_v21 = vmax.f32 %v425_v15, 0.0  ;;  %v339_v22 = vpop.f32.mrb[8].mxu0  ;;  %v428_v23 = vpop.f32.mrb[8].mxu1 }
 0x1c4   :  { %v1605_v24 = vpack.c.bf16 %v443_v17, %v439_v16  ;;  %v1613_v25 = vpack.c.bf16 %v445_v18, %v441_v8  ;;  %v341_v26 = vpop.f32.mrb[9].mxu0  ;;  %v430_v27 = vpop.f32.mrb[9].mxu1  ;;  %v340_v32 = vadd.f32 %v339_v22, %v241_v28  ;;  %v429_v33 = vadd.f32 %v428_v23, %v241_v28 }
 0x1c5   :  { %v1603_v29 = vpack.c.bf16 %v444_v20, %v440_v19  ;;  %v1611_v30 = vpack.c.bf16 %v446_v21, %v442_v13  ;;  %v342_v34 = vadd.f32 %v341_v26, %v241_v28  ;;  %v431_v35 = vadd.f32 %v430_v27, %v241_v28 }
 0x1c6   :  { %v447_v44 = vmax.f32 %v340_v32, 0.0  ;;  %v449_v45 = vmax.f32 %v429_v33, 0.0 }
 0x1c7   :  { %v345_v36 = vpop.f32.mrb[10].mxu0  ;;  %v434_v37 = vpop.f32.mrb[10].mxu1  ;;  %1604 = vmatprep.subr.bf16.mxu0 %v1603_v29  ;;  %1612 = vmatprep.subr.bf16.mxu1 %v1611_v30  ;;  %v448_v48 = vmax.f32 %v342_v34, 0.0  ;;  %v450_v49 = vmax.f32 %v431_v35, 0.0 }
 0x1c8   :  { %v346_v38 = vadd.f32 %v345_v36, %v246_v31  ;;  %v435_v39 = vadd.f32 %v434_v37, %v246_v31  ;;  %v347_v40 = vpop.f32.mrb[11].mxu0  ;;  %v436_v41 = vpop.f32.mrb[11].mxu1  ;;  %1606 = vmatpush1.bf16.msra.mxu0 %v1605_v24  ;;  %1614 = vmatpush1.bf16.msra.mxu1 %v1613_v25 }
 0x1c9   :  { %v348_v42 = vadd.f32 %v347_v40, %v246_v31  ;;  %v437_v43 = vadd.f32 %v436_v41, %v246_v31 }
 0x1ca   :  { %v451_v46 = vmax.f32 %v346_v38, 0.0  ;;  %v453_v47 = vmax.f32 %v435_v39, 0.0  ;;  %v484_v39 = vpop.permute.xlu0 %483 }
 0x1cb   :  { %v452_v50 = vmax.f32 %v348_v42, 0.0  ;;  %v454_v51 = vmax.f32 %v437_v43, 0.0  ;;  %v489_v42 = vpop.permute.xlu1 %488 }
 0x1cc   :  { %v1609_v52 = vpack.c.bf16 %v451_v46, %v447_v44  ;;  %v1617_v57 = vpack.c.bf16 %v453_v47, %v449_v45 }
 0x1cd   :  { %v1607_v58 = vpack.c.bf16 %v452_v50, %v448_v48  ;;  %v1615_v59 = vpack.c.bf16 %v454_v51, %v450_v49 }
 0x1cf   :  { %1608 = vmatprep.subr.bf16.mxu0 %v1607_v58  ;;  %1616 = vmatprep.subr.bf16.mxu1 %v1615_v59 }
 0x1d0   :  { %1610 = vmatpush1.bf16.msra.mxu0 %v1609_v52  ;;  %1618 = vmatpush1.bf16.msra.mxu1 %v1617_v57 }
 0x1d3   :  { %1478 = vmatmul.mubr.msk.f32.vlgmr.msra.gmra.mrb[12].mxu0 %vm511_vm2, %v1889_v60  ;;  %1486 = vmatmul.mubr.msk.f32.vlgmr.msra.gmra.mrb[12].mxu1 %vm511_vm2, %v1889_v60 }
 0x1d4   :  { %606 = vmatprep.mubr.f32.mxu0 %v1706_v5  ;;  %719 = vmatprep.mubr.f32.mxu1 %v1706_v5 }
 0x1d7   :  { %1479 = vmatmul.mubr.msk.f32.gmra.mrb[14].mxu0 %vm511_vm2, %v1900_v61  ;;  %1487 = vmatmul.mubr.msk.f32.gmra.mrb[14].mxu1 %vm511_vm2, %v1900_v61 }
 0x1d8   :  { %612 = vmatprep.mubr.f32.mxu0 %v1706_v5  ;;  %725 = vmatprep.mubr.f32.mxu1 %v1706_v5 }
 0x1db   :  { %1480 = vmatmul.mubr.msk.f32.gmra.mrb[16].mxu0 %vm511_vm2, %v1911_v62  ;;  %1488 = vmatmul.mubr.msk.f32.gmra.mrb[16].mxu1 %vm511_vm2, %v1911_v62 }
 0x1dc   :  { %618 = vmatprep.mubr.f32.mxu0 %v1706_v5  ;;  %731 = vmatprep.mubr.f32.mxu1 %v1706_v5 }
 0x1df   :  { %1481 = vmatmul.mubr.msk.f32.gmra.mrb[18].mxu0 %vm511_vm2, %v1922_v63  ;;  %1489 = vmatmul.mubr.msk.f32.gmra.mrb[18].mxu1 %vm511_vm2, %v1922_v63 }
 0x1e0   :  { %624 = vmatprep.mubr.f32.mxu0 %v1706_v5  ;;  %737 = vmatprep.mubr.f32.mxu1 %v1706_v5 }
 0x1e3   :  { %1482 = vmatmul.mubr.msk.f32.gmra.mrb[20].mxu0 %vm511_vm2, %v1933_v0  ;;  %1490 = vmatmul.mubr.msk.f32.gmra.mrb[20].mxu1 %vm511_vm2, %v1933_v0 }
 0x1e4   :  { %630 = vmatprep.mubr.f32.mxu0 %v1706_v5  ;;  %743 = vmatprep.mubr.f32.mxu1 %v1706_v5 }
 0x1e7   :  { %1483 = vmatmul.mubr.msk.f32.gmra.mrb[22].mxu0 %vm511_vm2, %v1944_v1  ;;  %1491 = vmatmul.mubr.msk.f32.gmra.mrb[22].mxu1 %vm511_vm2, %v1944_v1 }
 0x1e8   :  { %636 = vmatprep.mubr.f32.mxu0 %v1706_v5  ;;  %749 = vmatprep.mubr.f32.mxu1 %v1706_v5 }
 0x1eb   :  { %1484 = vmatmul.mubr.msk.f32.gmra.mrb[24].mxu0 %vm511_vm2, %v1955_v2  ;;  %1492 = vmatmul.mubr.msk.f32.gmra.mrb[24].mxu1 %vm511_vm2, %v1955_v2 }
 0x1ec   :  { %642 = vmatprep.mubr.f32.mxu0 %v1706_v5  ;;  %755 = vmatprep.mubr.f32.mxu1 %v1706_v5 }
 0x1ef   :  { %1485 = vmatmul.mubr.msk.f32.gmra.mrb[26].mxu0 %vm511_vm2, %v1966_v3  ;;  %1493 = vmatmul.mubr.msk.f32.gmra.mrb[26].mxu1 %vm511_vm2, %v1966_v3 }
 0x1f0   :  { %869 = vmatprep.mubr.f32.mxu0 %v1706_v5  ;;  %940 = vmatprep.mubr.f32.mxu1 %v1706_v5 }
 0x2a6   :  { %v602_v6 = vpop.f32.mrb[12].mxu0  ;;  %v715_v8 = vpop.f32.mrb[12].mxu1 }
 0x2a7   :  { %v604_v9 = vpop.f32.mrb[13].mxu0  ;;  %v717_v10 = vpop.f32.mrb[13].mxu1  ;;  %v603_v13 = vadd.f32 %v602_v6, %v474_v11  ;;  %v716_v14 = vadd.f32 %v715_v8, %v474_v11 }
 0x2a8   :  { %v605_v15 = vadd.f32 %v604_v9, %v474_v11  ;;  %v718_v16 = vadd.f32 %v717_v10, %v474_v11 }
 0x2a9   :  { %v762_v25 = vmax.f32 %v603_v13, 0.0  ;;  %v764_v26 = vmax.f32 %v716_v14, 0.0 }
 0x2aa   :  { %v608_v17 = vpop.f32.mrb[14].mxu0  ;;  %v721_v18 = vpop.f32.mrb[14].mxu1  ;;  %v763_v29 = vmax.f32 %v605_v15, 0.0  ;;  %v765_v30 = vmax.f32 %v718_v16, 0.0 }
 0x2ab   :  { %v609_v19 = vadd.f32 %v608_v17, %v479_v12  ;;  %v722_v20 = vadd.f32 %v721_v18, %v479_v12  ;;  %v610_v21 = vpop.f32.mrb[15].mxu0  ;;  %v723_v22 = vpop.f32.mrb[15].mxu1 }
 0x2ac   :  { %v611_v23 = vadd.f32 %v610_v21, %v479_v12  ;;  %v724_v24 = vadd.f32 %v723_v22, %v479_v12 }
 0x2ad   :  { %v766_v27 = vmax.f32 %v609_v19, 0.0  ;;  %v768_v28 = vmax.f32 %v722_v20, 0.0  ;;  %v494_v20 = vpop.permute.xlu0 %493 }
 0x2ae   :  { %v767_v31 = vmax.f32 %v611_v23, 0.0  ;;  %v769_v32 = vmax.f32 %v724_v24, 0.0  ;;  %v614_v33 = vpop.f32.mrb[16].mxu0  ;;  %v727_v34 = vpop.f32.mrb[16].mxu1 }
 0x2af   :  { %v1621_v35 = vpack.c.bf16 %v766_v27, %v762_v25  ;;  %v1637_v36 = vpack.c.bf16 %v768_v28, %v764_v26  ;;  %v616_v37 = vpop.f32.mrb[17].mxu0  ;;  %v729_v38 = vpop.f32.mrb[17].mxu1  ;;  %v615_v43 = vadd.f32 %v614_v33, %v484_v39  ;;  %v728_v44 = vadd.f32 %v727_v34, %v484_v39 }
 0x2b0   :  { %v1619_v40 = vpack.c.bf16 %v767_v31, %v763_v29  ;;  %v1635_v41 = vpack.c.bf16 %v769_v32, %v765_v30  ;;  %v617_v45 = vadd.f32 %v616_v37, %v484_v39  ;;  %v730_v46 = vadd.f32 %v729_v38, %v484_v39  ;;  %v499_v23 = vpop.permute.xlu1 %498 }
 0x2b1   :  { %v770_v59 = vmax.f32 %v615_v43, 0.0  ;;  %v772_v6 = vmax.f32 %v728_v44, 0.0 }
 0x2b2   :  { %v620_v47 = vpop.f32.mrb[18].mxu0  ;;  %v733_v48 = vpop.f32.mrb[18].mxu1  ;;  %1620 = vmatprep.subr.bf16.mxu0 %v1619_v40  ;;  %1636 = vmatprep.subr.bf16.mxu1 %v1635_v41  ;;  %v771_v10 = vmax.f32 %v617_v45, 0.0  ;;  %v773_v11 = vmax.f32 %v730_v46, 0.0 }
 0x2b3   :  { %v621_v49 = vadd.f32 %v620_v47, %v489_v42  ;;  %v734_v50 = vadd.f32 %v733_v48, %v489_v42  ;;  %v622_v51 = vpop.f32.mrb[19].mxu0  ;;  %v735_v52 = vpop.f32.mrb[19].mxu1  ;;  %1622 = vmatpush1.bf16.msra.mxu0 %v1621_v35  ;;  %1638 = vmatpush1.bf16.msra.mxu1 %v1637_v36 }
 0x2b4   :  { %v623_v57 = vadd.f32 %v622_v51, %v489_v42  ;;  %v736_v58 = vadd.f32 %v735_v52, %v489_v42 }
 0x2b5   :  { %v774_v8 = vmax.f32 %v621_v49, 0.0  ;;  %v776_v9 = vmax.f32 %v734_v50, 0.0  ;;  %v504_v50 = vpop.permute.xlu0 %503 }
 0x2b6   :  { %v775_v12 = vmax.f32 %v623_v57, 0.0  ;;  %v777_v13 = vmax.f32 %v736_v58, 0.0  ;;  %v626_v14 = vpop.f32.mrb[20].mxu0  ;;  %v739_v15 = vpop.f32.mrb[20].mxu1 }
 0x2b7   :  { %v1625_v16 = vpack.c.bf16 %v774_v8, %v770_v59  ;;  %v1641_v17 = vpack.c.bf16 %v776_v9, %v772_v6  ;;  %v628_v18 = vpop.f32.mrb[21].mxu0  ;;  %v741_v19 = vpop.f32.mrb[21].mxu1  ;;  %v627_v24 = vadd.f32 %v626_v14, %v494_v20  ;;  %v740_v25 = vadd.f32 %v739_v15, %v494_v20 }
 0x2b8   :  { %v1623_v21 = vpack.c.bf16 %v775_v12, %v771_v10  ;;  %v1639_v22 = vpack.c.bf16 %v777_v13, %v773_v11  ;;  %v629_v26 = vadd.f32 %v628_v18, %v494_v20  ;;  %v742_v27 = vadd.f32 %v741_v19, %v494_v20  ;;  %v509_v57 = vpop.permute.xlu1 %508 }
 0x2b9   :  { %v778_v36 = vmax.f32 %v627_v24, 0.0  ;;  %v780_v37 = vmax.f32 %v740_v25, 0.0 }
 0x2ba   :  { %v632_v28 = vpop.f32.mrb[22].mxu0  ;;  %v745_v29 = vpop.f32.mrb[22].mxu1  ;;  %1624 = vmatprep.subr.bf16.mxu0 %v1623_v21  ;;  %1640 = vmatprep.subr.bf16.mxu1 %v1639_v22  ;;  %v779_v40 = vmax.f32 %v629_v26, 0.0  ;;  %v781_v41 = vmax.f32 %v742_v27, 0.0 }
 0x2bb   :  { %v633_v30 = vadd.f32 %v632_v28, %v499_v23  ;;  %v746_v31 = vadd.f32 %v745_v29, %v499_v23  ;;  %v634_v32 = vpop.f32.mrb[23].mxu0  ;;  %v747_v33 = vpop.f32.mrb[23].mxu1  ;;  %1626 = vmatpush1.bf16.msra.mxu0 %v1625_v16  ;;  %1642 = vmatpush1.bf16.msra.mxu1 %v1641_v17  ;;  %v951_v29 = vld [vmem:[%s2041_s0 + $0x20] sm:$0xff]  ;;  %s1710_s0 = smov [#allocation2]  }
 0x2bc   :  { %v635_v34 = vadd.f32 %v634_v32, %v499_v23  ;;  %v748_v35 = vadd.f32 %v747_v33, %v499_v23 }
 0x2bd   :  { %v782_v38 = vmax.f32 %v633_v30, 0.0  ;;  %v784_v39 = vmax.f32 %v746_v31, 0.0  ;;  %v1980_v30 = vld [vmem:[%s2048_s7] sm:$0xff]  ;;  %v959_v31 = vpop.permute.xlu0 %958  ;;  %s1458_s7 = sshll.u32 %s1710_s0, 4  ;;  %s1459_s7 = int_to_ptr.vmem [resolvable:$true] %s1458_s7 }
 0x2be   :  { %v783_v42 = vmax.f32 %v635_v34, 0.0  ;;  %v785_v43 = vmax.f32 %v748_v35, 0.0  ;;  %v638_v44 = vpop.f32.mrb[24].mxu0  ;;  %v751_v45 = vpop.f32.mrb[24].mxu1  ;;  %s1682_s4 = scalar_lea.vmem %s1459_s7, 640  ;;  %p1687_p1 = scmp.lt.s32.totalorder %s1459_s7, %s1459_s7 }
 0x2bf   :  { %v1629_v46 = vpack.c.bf16 %v782_v38, %v778_v36  ;;  %v1645_v47 = vpack.c.bf16 %v784_v39, %v780_v37  ;;  %v640_v48 = vpop.f32.mrb[25].mxu0  ;;  %v753_v49 = vpop.f32.mrb[25].mxu1  ;;  %v639_v58 = vadd.f32 %v638_v44, %v504_v50  ;;  %v752_v59 = vadd.f32 %v751_v45, %v504_v50  ;;  %p1683_p0 = scmp.ne.s32.totalorder %s1459_s7, %s1682_s4  ;;  %p1688_p2 = scmp.lt.s32.totalorder %s1682_s4, %s1682_s4 }
 0x2c0   :  { %v1627_v51 = vpack.c.bf16 %v783_v42, %v779_v40  ;;  %v1643_v52 = vpack.c.bf16 %v785_v43, %v781_v41  ;;  %v641_v6 = vadd.f32 %v640_v48, %v504_v50  ;;  %v754_v8 = vadd.f32 %v753_v49, %v504_v50  ;;  %v964_v43 = vpop.permute.xlu1 %963 }
 0x2c1   :  { %v786_v17 = vmax.f32 %v639_v58, 0.0  ;;  %v788_v18 = vmax.f32 %v752_v59, 0.0  ;;  %v1060_v32 = vpop.permute.xlu0 %1059  ;;  %p1689_p3 = por %p1688_p2, %p1687_p1 }
 0x2c2   :  { %v644_v9 = vpop.f32.mrb[26].mxu0  ;;  %v757_v10 = vpop.f32.mrb[26].mxu1  ;;  %1628 = vmatprep.subr.bf16.mxu0 %v1627_v51  ;;  %1644 = vmatprep.subr.bf16.mxu1 %v1643_v52  ;;  %v787_v21 = vmax.f32 %v641_v6, 0.0  ;;  %v789_v22 = vmax.f32 %v754_v8, 0.0 }
 0x2c3   :  { %v645_v11 = vadd.f32 %v644_v9, %v509_v57  ;;  %v758_v12 = vadd.f32 %v757_v10, %v509_v57  ;;  %v646_v13 = vpop.f32.mrb[27].mxu0  ;;  %v759_v14 = vpop.f32.mrb[27].mxu1  ;;  %1630 = vmatpush1.bf16.msra.mxu0 %v1629_v46  ;;  %1646 = vmatpush1.bf16.msra.mxu1 %v1645_v47  ;;  %p1690_p4 = pnand %p1689_p3, %p1683_p0 }
 0x2c4   :  { %v647_v15 = vadd.f32 %v646_v13, %v509_v57  ;;  %v760_v16 = vadd.f32 %v759_v14, %v509_v57  ;;  %v1065_v51 = vpop.permute.xlu1 %1064 }
 0x2c5   :  { %v790_v19 = vmax.f32 %v645_v11, 0.0  ;;  %v792_v20 = vmax.f32 %v758_v12, 0.0  ;;  %v1070_v33 = vpop.permute.xlu0 %1069 }
 0x2c6   :  { %v791_v23 = vmax.f32 %v647_v15, 0.0  ;;  %v793_v24 = vmax.f32 %v760_v16, 0.0 }
 0x2c7   :  { %v1633_v25 = vpack.c.bf16 %v790_v19, %v786_v17  ;;  %v1649_v26 = vpack.c.bf16 %v792_v20, %v788_v18 }
 0x2c8   :  { %v1631_v27 = vpack.c.bf16 %v791_v23, %v787_v21  ;;  %v1647_v28 = vpack.c.bf16 %v793_v24, %v789_v22  ;;  %v1075_v8 = vpop.permute.xlu1 %1074 }
 0x2c9   :  { %v1994_v34 = vpop.permute.xlu0 %1196 }
 0x2ca   :  { %1632 = vmatprep.subr.bf16.mxu0 %v1631_v27  ;;  %1648 = vmatprep.subr.bf16.mxu1 %v1647_v28 }
 0x2cb   :  { %1634 = vmatpush1.bf16.msra.mxu0 %v1633_v25  ;;  %1650 = vmatpush1.bf16.msra.mxu1 %v1649_v26 }
 0x2cc   :  { %1541 = vmatprep.subr.mxu0 %v951_v29 }
 0x2cd   :  { %v1996_v35 = vpop.permute.xlu0 %1206 }
 0x2ce   :  { %1494 = vmatmul.mubr.msk.f32.vlgmr.msra.gmra.mrb[28].mxu0 %vm801_vm3, %v1980_v30  ;;  %1495 = vmatmul.mubr.msk.f32.vlgmr.msra.gmra.mrb[28].mxu1 %vm801_vm3, %v1980_v30 }
 0x2cf   :  { %1542 = vmatpush3.msra.mxu0 %v951_v29  ;;  %1543 = vmatprep.mubr.msk.f32.mxu0 %vm51_vm0, %v1776_v4 }
 0x2d0   :  { %1550 = vmatprep.mubr.msk.f32.mxu1 %vm248_vm1, %v1845_v53 }
 0x2d1   :  { %v1998_v36 = vpop.permute.xlu0 %1216 }
 0x2d2   :  { %1544 = vmatmul.mubr.msk.f32.vlgmr.msra.gmra.mrb[30].mxu0 %vm51_vm0, %v1792_v7 }
 0x2d3   :  { %1564 = vmatprep.mubr.msk.f32.mxu0 %vm511_vm2, %v1889_v60 }
 0x2d5   :  { %v2000_v37 = vpop.permute.xlu0 %1226 }
 0x2d9   :  { %v799_v4 = vpop.permute.xlu0 %798 }
 0x3a1   :  { %v871_v38 = vpop.f32.mrb[28].mxu0  ;;  %v942_v53 = vpop.f32.mrb[28].mxu1 }
 0x3a2   :  { %v872_v39 = vadd.f32 %v871_v38, %v799_v4  ;;  %v943_v40 = vadd.f32 %v942_v53, %v799_v4  ;;  %v873_v7 = vpop.f32.mrb[29].mxu0  ;;  %v944_v41 = vpop.f32.mrb[29].mxu1 }
 0x3a3   :  { %v874_v42 = vadd.f32 %v873_v7, %v799_v4  ;;  %v945_v60 = vadd.f32 %v944_v41, %v799_v4 }
 0x3a4   :  { %947 = vst [vmem:[#allocation2] sm:$0xff] %v872_v39  ;;  %949 = vst [vmem:[#allocation2 + $0x10] sm:$0xff] %v943_v40 }
 0x3a5   :  { %948 = vst [vmem:[#allocation2 + $0x8] sm:$0xff] %v874_v42  ;;  %950 = vst [vmem:[#allocation2 + $0x18] sm:$0xff] %v945_v60  ;;  %v1545_v44 = vpop.f32.mrb[30].mxu0 }
 0x3a6   :  { %v1044_v45 = vadd.f32 %v1545_v44, %v964_v43  ;;  %v1038_v46 = vpop.f32.mrb[31].mxu0 }
 0x3a7   :  { %v1039_v47 = vadd.f32 %v1038_v46, %v959_v31 }
 0x3a8   :  { %v1048_v48 = vmax.f32 %v1044_v45, 0.0 }
 0x3a9   :  { %v1047_v49 = vmax.f32 %v1039_v47, 0.0 }
 0x3ab   :  { %v1651_v50 = vpack.c.bf16 %v1048_v48, %v1047_v49 }
 0x3ad   :  { %1652 = vmatprep.subr.bf16.mxu1 %v1651_v50 }
 0x3ae   :  { %1654 = vmatpush3.bf16.msra.mxu1 %v1651_v50 }
 0x3b1   :  { %1551 = vmatmul.mubr.msk.f32.vlgmr.msra.gmra.mrb[30].mxu1 %vm248_vm1, %v1856_v54 }
 0x3b2   :  { %1553 = vmatprep.mubr.msk.f32.mxu1 %vm248_vm1, %v1867_v55 }
 0x3b5   :  { %1554 = vmatmul.mubr.msk.f32.gmra.mrb[32].mxu1 %vm248_vm1, %v1878_v56  ;;  %v1708_v56 = vmov 0.0|0.0  }
 0x3b6   :  { %1663 = vmatprep.subr.bf16.mxu1 %v1708_v56  ;;  %1592 = vmatprep.mubr.msk.f32.mxu1 %vm1709_vm4, %v1706_v5 }
 0x484   :  { %v1552_v52 = vpop.f32.mrb[30].mxu1 }
 0x485   :  { %v1161_v57 = vadd.f32 %v1552_v52, %v1065_v51  ;;  %v1155_v58 = vpop.f32.mrb[31].mxu1 }
 0x486   :  { %v1156_v59 = vadd.f32 %v1155_v58, %v1060_v32 }
 0x487   :  { %v1175_v6 = vmax.f32 %v1161_v57, 0.0 }
 0x488   :  { %v1174_v9 = vmax.f32 %v1156_v59, 0.0  ;;  %v1555_v10 = vpop.f32.mrb[32].mxu1 }
 0x489   :  { %v1171_v11 = vadd.f32 %v1555_v10, %v1075_v8  ;;  %v1165_v12 = vpop.f32.mrb[33].mxu1 }
 0x48a   :  { %v1655_v13 = vpack.c.bf16 %v1175_v6, %v1174_v9  ;;  %v1166_v14 = vadd.f32 %v1165_v12, %v1070_v33 }
 0x48b   :  { %v1177_v54 = vmax.f32 %v1171_v11, 0.0 }
 0x48c   :  { %v1176_v15 = vmax.f32 %v1166_v14, 0.0  ;;  %1656 = vmatprep.subr.bf16.mxu0 %v1655_v13 }
 0x48d   :  { %1658 = vmatpush3.bf16.msra.mxu0 %v1655_v13 }
 0x48e   :  { %v1659_v55 = vpack.c.bf16 %v1177_v54, %v1176_v15 }
 0x490   :  { %1660 = vmatprep.subr.bf16.mxu0 %v1659_v55 }
 0x491   :  { %1662 = vmatpush3.bf16.msra.mxu0 %v1659_v55 }
 0x494   :  { %1565 = vmatmul.mubr.msk.f32.vlgmr.msra.gmra.mrb[32].mxu0 %vm511_vm2, %v1900_v61  ;;  %v1202_v61 = vpop.permute.xlu1 %1201 }
 0x495   :  { %1567 = vmatprep.mubr.msk.f32.mxu0 %vm511_vm2, %v1911_v62 }
 0x498   :  { %1568 = vmatmul.mubr.msk.f32.gmra.mrb[34].mxu0 %vm511_vm2, %v1922_v63  ;;  %v1212_v62 = vpop.permute.xlu1 %1211 }
 0x499   :  { %1570 = vmatprep.mubr.msk.f32.mxu0 %vm511_vm2, %v1933_v0 }
 0x49c   :  { %1571 = vmatmul.mubr.msk.f32.gmra.mrb[36].mxu0 %vm511_vm2, %v1944_v1  ;;  %v1222_v21 = vpop.permute.xlu1 %1221 }
 0x49d   :  { %1573 = vmatprep.mubr.msk.f32.mxu0 %vm511_vm2, %v1955_v2 }
 0x4a0   :  { %1574 = vmatmul.mubr.msk.f32.gmra.mrb[38].mxu0 %vm511_vm2, %v1966_v3  ;;  %v1232_v31 = vpop.permute.xlu1 %1231 }
 0x567   :  { %v1566_v63 = vpop.f32.mrb[32].mxu0 }
 0x568   :  { %v1330_v16 = vadd.f32 %v1566_v63, %v1202_v61  ;;  %v1324_v17 = vpop.f32.mrb[33].mxu0 }
 0x569   :  { %v1325_v0 = vadd.f32 %v1324_v17, %v1994_v34 }
 0x56a   :  { %v1364_v18 = vmax.f32 %v1330_v16, 0.0 }
 0x56b   :  { %v1363_v1 = vmax.f32 %v1325_v0, 0.0  ;;  %v1569_v19 = vpop.f32.mrb[34].mxu0 }
 0x56c   :  { %v1340_v20 = vadd.f32 %v1569_v19, %v1212_v62  ;;  %v1334_v2 = vpop.f32.mrb[35].mxu0 }
 0x56d   :  { %v1664_v22 = vpack.c.bf16 %v1364_v18, %v1363_v1  ;;  %v1335_v3 = vadd.f32 %v1334_v2, %v1996_v35 }
 0x56e   :  { %v1366_v23 = vmax.f32 %v1340_v20, 0.0 }
 0x56f   :  { %v1365_v24 = vmax.f32 %v1335_v3, 0.0  ;;  %v1572_v25 = vpop.f32.mrb[36].mxu0  ;;  %1665 = vmatpush3.bf16.msra.mxu1 %v1664_v22 }
 0x570   :  { %v1350_v5 = vadd.f32 %v1572_v25, %v1222_v21  ;;  %v1344_v26 = vpop.f32.mrb[37].mxu0  ;;  %1666 = vmatprep.subr.bf16.mxu1 %v1708_v56 }
 0x571   :  { %v1667_v27 = vpack.c.bf16 %v1366_v23, %v1365_v24  ;;  %v1345_v28 = vadd.f32 %v1344_v26, %v1998_v36  ;;  %v1376_v36 = vpop.permute.xlu1 %1375 }
 0x572   :  { %v1368_v29 = vmax.f32 %v1350_v5, 0.0 }
 0x573   :  { %v1367_v32 = vmax.f32 %v1345_v28, 0.0  ;;  %v1575_v33 = vpop.f32.mrb[38].mxu0  ;;  %1668 = vmatpush3.bf16.msra.mxu1 %v1667_v27 }
 0x574   :  { %v1360_v34 = vadd.f32 %v1575_v33, %v1232_v31  ;;  %v1354_v4 = vpop.f32.mrb[39].mxu0  ;;  %1669 = vmatprep.subr.bf16.mxu1 %v1708_v56 }
 0x575   :  { %v1670_v38 = vpack.c.bf16 %v1368_v29, %v1367_v32  ;;  %v1355_v35 = vadd.f32 %v1354_v4, %v2000_v37 }
 0x576   :  { %v1370_v53 = vmax.f32 %v1360_v34, 0.0 }
 0x577   :  { %v1369_v39 = vmax.f32 %v1355_v35, 0.0  ;;  %1671 = vmatpush3.bf16.msra.mxu1 %v1670_v38 }
 0x578   :  { %1672 = vmatprep.subr.bf16.mxu1 %v1708_v56 }
 0x579   :  { %v1673_v40 = vpack.c.bf16 %v1370_v53, %v1369_v39 }
 0x57b   :  { %1674 = vmatpush3.bf16.msra.mxu1 %v1673_v40 }
 0x57e   :  { %1593 = vmatmul.mubr.msk.f32.vlgmr.msra.gmra.mrb[34].mxu1 %vm801_vm3, %v1980_v30 }
 0x651   :  { %v1447_v7 = vpop.f32.mrb[34].mxu1 }
 0x652   :  { %v1448_v41 = vadd.f32 %v1447_v7, %v1376_v36  ;;  %v1594_v42 = vpop.f32.mrb[35].mxu1 }
 0x654   :  { %1451 = vst [vmem:[#allocation2 + $0x20] sm:$0xff] %v1448_v41 }
 0x655   :  { %1693 = shalt.err (!%p1690_p4)
}
 0x656   :  { %s1694_s27 = scalar_lea.hbm %s2050_s9, 640 }
 0x657   :  { %p1695_p5 = scmp.ne.s32.totalorder %s2050_s9, %s1694_s27  ;;  %p1698_p6 = scmp.lt.u32.totalorder %s1694_s27, %s2050_s9 }
 0x659   :  { %p1700_p7 = pnand %p1698_p6, %p1695_p5 }
 0x65b   :  { %1703 = shalt.err (!%p1700_p7)
}
 0x65c   :  { %1461 = dma.vmem_to_hbm [thread:$0]  %s1459_s7, 640, %s2050_s9, [#allocation3]  }
 0x65d   :  { %1704 = dma.done.wait [#allocation3], 640  }
 0x65e   :  { %1705 = vsyncadd [#allocation3], 4294966656 }
 0x65f   :  { %1465 = vsyncpa [#allocation3], 1 }

</bundles_post_ra>
